<compile_context>
chip_gen: v7x
topology: tpu7x:2x2x1
jax: 0.10.0
libtpu: 0.0.40
codegen_flags: <defaults>
</compile_context>

<pallas_src>
import functools
import math

import jax
import jax.numpy as jnp
from jax import lax
from jax.experimental import pallas as pl
from jax.experimental.pallas import tpu as pltpu


_NEG_INF = -1e30


# ----------------------------------------------------------------------------
# helpers
# ----------------------------------------------------------------------------
def _round_up(x: int, m: int) -> int:
    return (x + m - 1) // m * m


def _pad_to(a, shape):
    pads = [(0, t - s) for s, t in zip(a.shape, shape)]
    if any(p[1] for p in pads):
        return jnp.pad(a, pads)
    return a


def _head_group(heads: int, d: int) -> int:
    """#heads per attention grid step so the lane block hb*d is 128-aligned."""
    if d % 128 == 0:
        return 1
    hb = 128 // math.gcd(d, 128)          # == lcm(d, 128) // d
    if hb > heads or heads % hb != 0:
        hb = heads                        # fallback: all heads in one group
    return hb


# ----------------------------------------------------------------------------
# tiled linear (x @ W + b) kernel
# ----------------------------------------------------------------------------
def _linear_kernel(x_ref, w_ref, b_ref, o_ref, acc_ref):
    # grid = (M tiles, N tiles, K tiles); K is the reduction axis (last).
    @pl.when(pl.program_id(2) == 0)
    def _():
        acc_ref[...] = jnp.zeros_like(acc_ref)

    acc_ref[...] += jnp.dot(
        x_ref[...], w_ref[...], preferred_element_type=jnp.float32
    )

    @pl.when(pl.program_id(2) == pl.num_programs(2) - 1)
    def _():
        o_ref[...] = (acc_ref[...] + b_ref[...]).astype(o_ref.dtype)


def pallas_linear(x2d, w, b=None, *, out_dtype=None, tm=512, tn=1024, tk=512):
    """x2d: (M, K), w: (K, N), b: (N,) or None -> (M, N)."""
    M, K = x2d.shape
    Kw, N = w.shape
    assert K == Kw
    out_dtype = x2d.dtype if out_dtype is None else out_dtype

    # shrink tiles for small problems; keep (8, 128) alignment via padding
    tm = min(tm, _round_up(M, 8))
    tk = min(tk, _round_up(K, 128))
    tn = min(tn, _round_up(N, 128))
    Mp, Kp, Np = _round_up(M, tm), _round_up(K, tk), _round_up(N, tn)

    # v7x megacore: keep >= 2 tiles on a parallel axis when the grid would
    # otherwise collapse to 1x1 (small projections).
    if Mp // tm == 1 and Np // tn == 1 and Np % 256 == 0:
        tn = Np // 2

    xp = _pad_to(x2d, (Mp, Kp))
    wp = _pad_to(w, (Kp, Np))
    if b is None:
        bp = jnp.zeros((1, Np), dtype=jnp.float32)
    else:
        bp = _pad_to(b.reshape(1, N).astype(jnp.float32), (1, Np))

    grid = (Mp // tm, Np // tn, Kp // tk)

    out = pl.pallas_call(
        _linear_kernel,
        out_shape=jax.ShapeDtypeStruct((Mp, Np), out_dtype),
        grid_spec=pltpu.PrefetchScalarGridSpec(
            num_scalar_prefetch=0,
            grid=grid,
            in_specs=[
                pl.BlockSpec((tm, tk), lambda i, j, k: (i, k)),   # x tile
                pl.BlockSpec((tk, tn), lambda i, j, k: (k, j)),   # w tile
                pl.BlockSpec((1, tn), lambda i, j, k: (0, j)),    # bias tile
            ],
            out_specs=pl.BlockSpec((tm, tn), lambda i, j, k: (i, j)),
            scratch_shapes=[pltpu.VMEM((tm, tn), jnp.float32)],
        ),
        compiler_params=pltpu.CompilerParams(
            dimension_semantics=("parallel", "parallel", "arbitrary")
        ),
    )(xp, wp, bp)

    return out[:M, :N]


# ----------------------------------------------------------------------------
# flash attention kernel (heads kept in the lane dimension, no transposes)
# ----------------------------------------------------------------------------
def _flash_attn_kernel(q_ref, k_ref, v_ref, o_ref, m_sc, l_sc, acc_sc, *,
                       hb, d, block_kv, kv_len, mask_padding):
    ki = pl.program_id(3)
    nkv = pl.num_programs(3)

    @pl.when(ki == 0)
    def _():
        m_sc[...] = jnp.full_like(m_sc, _NEG_INF)
        l_sc[...] = jnp.zeros_like(l_sc)
        acc_sc[...] = jnp.zeros_like(acc_sc)

    q = q_ref[0]                      # (tq,  hb*d)  (softmax scale folded in Wq)
    k = k_ref[0]                      # (tkv, hb*d)
    v = v_ref[0]                      # (tkv, hb*d)

    if mask_padding:                  # static: only emitted if kv is padded
        col = ki * block_kv + lax.broadcasted_iota(jnp.int32, (1, block_kv), 1)
        kv_mask = col < kv_len        # (1, tkv)

    for h in range(hb):               # static unroll over heads in this group
        sl = slice(h * d, (h + 1) * d)
        q_h, k_h, v_h = q[:, sl], k[:, sl], v[:, sl]

        s = lax.dot_general(                       # (tq, tkv), f32 on the MXU
            q_h, k_h, (((1,), (1,)), ((), ())),
            preferred_element_type=jnp.float32)
        if mask_padding:
            s = jnp.where(kv_mask, s, _NEG_INF)

        m_prev = m_sc[h]                                          # (tq, 1)
        m_new = jnp.maximum(m_prev, s.max(axis=-1, keepdims=True))
        alpha = jnp.exp(m_prev - m_new)
        p = jnp.exp(s - m_new)
        l_sc[h] = alpha * l_sc[h] + p.sum(axis=-1, keepdims=True)
        acc_sc[h] = alpha * acc_sc[h] + lax.dot_general(
            p.astype(v_h.dtype), v_h, (((1,), (0,)), ((), ())),
            preferred_element_type=jnp.float32)
        m_sc[h] = m_new

    @pl.when(ki == nkv - 1)
    def _():
        for h in range(hb):
            o_ref[0, :, h * d:(h + 1) * d] = (
                acc_sc[h] * pl.reciprocal(l_sc[h], approx=True)
            ).astype(o_ref.dtype)


def flash_attention(q, k, v, *, heads, dim_head,
                    q_col0=0, k_col0=0, v_col0=0, tq=512, tkv=512):
    """q: (b, n, Wq), k/v: (b, m, Wk/Wv) in (b, seq, heads*dim) layout.

    Head h of q lives in columns q_col0 + h*dim_head (likewise k/v), so q/k/v
    may all alias the same fused projection buffer.  Returns (b, n, heads*dim).
    """
    b, n, wq_cols = q.shape
    _, m, _ = k.shape
    d = dim_head
    inner = heads * d
    hb = _head_group(heads, d)
    lb = hb * d                       # lane-block width per grid step
    n_groups = heads // hb

    # BlockSpec last-dim constraint: lb % 128 == 0, or lb spans the full width.
    full_width = (q.shape[2] == lb and k.shape[2] == lb and v.shape[2] == lb)
    assert lb % 128 == 0 or full_width
    assert q.shape[2] % lb == 0 and k.shape[2] % lb == 0 and v.shape[2] % lb == 0
    assert q_col0 % lb == 0 and k_col0 % lb == 0 and v_col0 % lb == 0
    qg0, kg0, vg0 = q_col0 // lb, k_col0 // lb, v_col0 // lb

    tq = min(tq, _round_up(n, 8))
    tkv = min(tkv, _round_up(m, 128))   # 128-lane aligned kv tiles
    n_p = _round_up(n, tq)
    m_p = _round_up(m, tkv)

    qp = _pad_to(q, (b, n_p, q.shape[2]))
    kp = _pad_to(k, (b, m_p, k.shape[2]))
    vp = _pad_to(v, (b, m_p, v.shape[2]))

    grid = (b, n_groups, n_p // tq, m_p // tkv)
    kernel = functools.partial(
        _flash_attn_kernel, hb=hb, d=d, block_kv=tkv, kv_len=m,
        mask_padding=(m_p > m))

    out = pl.pallas_call(
        kernel,
        out_shape=jax.ShapeDtypeStruct((b, n_p, inner), q.dtype),
        grid_spec=pltpu.PrefetchScalarGridSpec(
            num_scalar_prefetch=0,
            grid=grid,
            in_specs=[
                pl.BlockSpec((1, tq, lb),
                             lambda bi, g, qi, ki: (bi, qi, qg0 + g)),
                pl.BlockSpec((1, tkv, lb),
                             lambda bi, g, qi, ki: (bi, ki, kg0 + g)),
                pl.BlockSpec((1, tkv, lb),
                             lambda bi, g, qi, ki: (bi, ki, vg0 + g)),
            ],
            out_specs=pl.BlockSpec((1, tq, lb),
                                   lambda bi, g, qi, ki: (bi, qi, g)),
            scratch_shapes=[
                pltpu.VMEM((hb, tq, 1), jnp.float32),   # running max
                pltpu.VMEM((hb, tq, 1), jnp.float32),   # running denom
                pltpu.VMEM((hb, tq, d), jnp.float32),   # accumulator
            ],
        ),
        compiler_params=pltpu.CompilerParams(
            dimension_semantics=("parallel", "parallel", "parallel",
                                 "arbitrary")
        ),
    )(qp, kp, vp)

    return out[:, :n, :]


# ----------------------------------------------------------------------------
# full CrossAttention forward
# ----------------------------------------------------------------------------
def cross_attention(x, wq, wk, wv, wo, bo, *, heads, context=None,
                    compute_dtype=jnp.bfloat16):
    """
    x: (b, n, query_dim); context: (b, m, context_dim) or None (self-attn).
    wq: (query_dim, inner)  wk/wv: (context_dim, inner)
    wo: (inner, query_dim)  bo: (query_dim,)
    """
    out_dtype = x.dtype
    b, n, query_dim = x.shape
    ctx = x if context is None else context
    _, m, _ = ctx.shape
    inner = wq.shape[1]
    assert inner % heads == 0
    d = inner // heads
    scale = d ** (-0.5)

    cd = compute_dtype
    x2d = x.astype(cd).reshape(b * n, query_dim)
    wq_s = (wq * scale).astype(cd)            # fold softmax scale into Wq (free)
    wk_c, wv_c = wk.astype(cd), wv.astype(cd)

    hb = _head_group(heads, d)
    fused_ok = (hb * d) % 128 == 0            # lane block must be 128-aligned to
                                              # address q/k/v inside a fused buffer

    if context is None and fused_ok:
        # single fused qkv matmul; attention reads q/k/v via column offsets.
        qkv = pallas_linear(x2d, jnp.concatenate([wq_s, wk_c, wv_c], axis=1))
        qkv3 = qkv.reshape(b, n, 3 * inner)
        att = flash_attention(qkv3, qkv3, qkv3, heads=heads, dim_head=d,
                              q_col0=0, k_col0=inner, v_col0=2 * inner)
    elif fused_ok:
        ctx2d = ctx.astype(cd).reshape(b * m, ctx.shape[2])
        q3 = pallas_linear(x2d, wq_s).reshape(b, n, inner)
        kv = pallas_linear(ctx2d, jnp.concatenate([wk_c, wv_c], axis=1))
        kv3 = kv.reshape(b, m, 2 * inner)
        att = flash_attention(q3, kv3, kv3, heads=heads, dim_head=d,
                              q_col0=0, k_col0=0, v_col0=inner)
    else:
        # tiny-head fallback (inner not 128-aligned): separate full-width buffers.
        ctx2d = ctx.astype(cd).reshape(b * m, ctx.shape[2])
        q3 = pallas_linear(x2d, wq_s).reshape(b, n, inner)
        k3 = pallas_linear(ctx2d, wk_c).reshape(b, m, inner)
        v3 = pallas_linear(ctx2d, wv_c).reshape(b, m, inner)
        att = flash_attention(q3, k3, v3, heads=heads, dim_head=d)

    # att: (b, n, inner) — head merge is a free reshape (no transpose).
    out2d = pallas_linear(att.reshape(b * n, inner), wo.astype(cd), bo,
                          out_dtype=out_dtype)
    # TODO(synk): nn.Dropout in to_out is identity at inference (p=0.0 / eval).
    return out2d.reshape(b, n, query_dim)


# ----------------------------------------------------------------------------
# reference (plain JAX, f32) + test
# ----------------------------------------------------------------------------
def _reference(x, context, wq, wk, wv, wo, bo, heads):
    b, n, _ = x.shape
    ctx = x if context is None else context
    q, k, v = x @ wq, ctx @ wk, ctx @ wv
    d = q.shape[-1] // heads

    def split(t):
        bb, s, _ = t.shape
        return t.reshape(bb, s, heads, d).transpose(0, 2, 1, 3)

    qh, kh, vh = split(q), split(k), split(v)
    s = jnp.einsum("bhid,bhjd->bhij", qh, kh) * (d ** -0.5)
    a = jax.nn.softmax(s, axis=-1)
    o = jnp.einsum("bhij,bhjd->bhid", a, vh)
    o = o.transpose(0, 2, 1, 3).reshape(b, n, heads * d)
    return o @ wo + bo


if __name__ == "__main__":
    def init_linear(k, fan_in, fan_out, bias):
        bound = 1.0 / math.sqrt(fan_in)
        kw, kb = jax.random.split(k)
        w = jax.random.uniform(kw, (fan_in, fan_out), jnp.float32, -bound, bound)
        bvec = (jax.random.uniform(kb, (fan_out,), jnp.float32, -bound, bound)
                if bias else None)
        return w, bvec

    def run_case(name, *, batch, seq, query_dim, heads, dim_head, ctx_seq,
                 context_dim, self_attn, compute_dtype, tol, key):
        inner = heads * dim_head
        ks = jax.random.split(key, 8)
        x = jax.random.normal(ks[0], (batch, seq, query_dim), jnp.float32)
        kv_in = query_dim if self_attn else context_dim
        context = (None if self_attn else
                   jax.random.normal(ks[1], (batch, ctx_seq, context_dim),
                                     jnp.float32))
        wq, _ = init_linear(ks[2], query_dim, inner, False)
        wk, _ = init_linear(ks[3], kv_in, inner, False)
        wv, _ = init_linear(ks[4], kv_in, inner, False)
        wo, bo = init_linear(ks[5], inner, query_dim, True)

        out = cross_attention(x, wq, wk, wv, wo, bo, heads=heads,
                              context=context, compute_dtype=compute_dtype)
        jax.block_until_ready(out)
        ref = _reference(x, context, wq, wk, wv, wo, bo, heads)
        err = float(jnp.max(jnp.abs(out.astype(jnp.float32) - ref)))
        assert err < tol, f"{name}: max abs err {err} (tol {tol})"

    key = jax.random.PRNGKey(0)
    k1, k2, k3, k4 = jax.random.split(key, 4)

    # SD-style heads (dim_head=64): lane-dense head groups + fused projections.
    run_case("cross-attn bf16", batch=2, seq=8, query_dim=32, heads=4,
             dim_head=64, ctx_seq=12, context_dim=24, self_attn=False,
             compute_dtype=jnp.bfloat16, tol=1e-1, key=k1)
    run_case("self-attn bf16 (fused qkv)", batch=2, seq=8, query_dim=32,
             heads=4, dim_head=64, ctx_seq=8, context_dim=32, self_attn=True,
             compute_dtype=jnp.bfloat16, tol=1e-1, key=k2)
    # f32 paths: tight numerical check of the same kernels.
    run_case("cross-attn f32", batch=2, seq=8, query_dim=32, heads=4,
             dim_head=64, ctx_seq=12, context_dim=24, self_attn=False,
             compute_dtype=jnp.float32, tol=2e-3, key=k3)
    # tiny heads: exercises the full-width (inner < 128) fallback path.
    run_case("cross-attn tiny-head f32", batch=2, seq=8, query_dim=32, heads=2,
             dim_head=16, ctx_seq=12, context_dim=24, self_attn=False,
             compute_dtype=jnp.float32, tol=2e-3, key=k4)

    print("KERNEL_OK")
</pallas_src>

<mosaic_0001>
module attributes {stable_mosaic.version = 11 : i64} {
  func.func @_linear_kernel(%arg0: i32, %arg1: i32, %arg2: i32, %arg3: memref<16x128xbf16, #tpu.memory_space<vmem>>, %arg4: memref<128x128xbf16, #tpu.memory_space<vmem>>, %arg5: memref<1x128xf32, #tpu.memory_space<vmem>>, %arg6: memref<16x128xbf16, #tpu.memory_space<vmem>>, %arg7: memref<16x128xf32, #tpu.memory_space<vmem>>) attributes {dimension_semantics = [#tpu.dimension_semantics<parallel>, #tpu.dimension_semantics<parallel>, #tpu.dimension_semantics<arbitrary>], iteration_bounds = array<i64: 1, 2, 1>, scalar_prefetch = 0 : i64, scratch_operands = 1 : i64, tpu.core_type = #tpu.core_type<tc>, window_params = [{transform_indices = @transform_0, window_bounds = array<i64: 16, 128>}, {transform_indices = @transform_1, window_bounds = array<i64: 128, 128>}, {transform_indices = @transform_2, window_bounds = array<i64: 1, 128>}, {transform_indices = @transform_3, window_bounds = array<i64: 16, 128>}]} {
    %c0_i32 = arith.constant 0 : i32
    %0 = arith.cmpi eq, %arg2, %c0_i32 : i32
    %1 = arith.extui %0 : i1 to i32
    %c0_i32_0 = arith.constant 0 : i32
    %2 = arith.cmpi ne, %1, %c0_i32_0 : i32
    scf.if %2 {
      %cst_10 = arith.constant 0.000000e+00 : f32
      %12 = vector.broadcast %cst_10 : f32 to vector<16x128xf32>
      %c0_11 = arith.constant 0 : index
      %c0_12 = arith.constant 0 : index
      %13 = vector.load %arg7[%c0_11, %c0_12] : memref<16x128xf32, #tpu.memory_space<vmem>>, vector<16x128xf32>
      tpu.vector_store %arg7[%c0_11, %c0_12], %12 {strides = array<i32>} : memref<16x128xf32, #tpu.memory_space<vmem>>, vector<16x128xf32>,
    } else {
    }
    %c0 = arith.constant 0 : index
    %c0_1 = arith.constant 0 : index
    %3 = vector.load %arg7[%c0, %c0_1] : memref<16x128xf32, #tpu.memory_space<vmem>>, vector<16x128xf32>
    %c0_2 = arith.constant 0 : index
    %c0_3 = arith.constant 0 : index
    %4 = vector.load %arg3[%c0_2, %c0_3] : memref<16x128xbf16, #tpu.memory_space<vmem>>, vector<16x128xbf16>
    %c0_4 = arith.constant 0 : index
    %c0_5 = arith.constant 0 : index
    %5 = vector.load %arg4[%c0_4, %c0_5] : memref<128x128xbf16, #tpu.memory_space<vmem>>, vector<128x128xbf16>
    %cst = arith.constant dense<0.000000e+00> : vector<16x128xf32>
    %6 = tpu.matmul %4, %5, %cst {dimension_numbers = #tpu.dot_dimension_numbers<[1], [0], [0], [1], [0, 0, 1, 1], [], []>} : vector<16x128xbf16>, vector<128x128xbf16>, vector<16x128xf32> -> vector<16x128xf32>
    %7 = arith.addf %3, %6 : vector<16x128xf32>
    %c0_6 = arith.constant 0 : index
    %c0_7 = arith.constant 0 : index
    %8 = vector.load %arg7[%c0_6, %c0_7] : memref<16x128xf32, #tpu.memory_space<vmem>>, vector<16x128xf32>
    tpu.vector_store %arg7[%c0_6, %c0_7], %7 {strides = array<i32>} : memref<16x128xf32, #tpu.memory_space<vmem>>, vector<16x128xf32>,
    %c0_i32_8 = arith.constant 0 : i32
    %9 = arith.cmpi eq, %arg2, %c0_i32_8 : i32
    %10 = arith.extui %9 : i1 to i32
    %c0_i32_9 = arith.constant 0 : i32
    %11 = arith.cmpi ne, %10, %c0_i32_9 : i32
    scf.if %11 {
      %c0_10 = arith.constant 0 : index
      %c0_11 = arith.constant 0 : index
      %12 = vector.load %arg7[%c0_10, %c0_11] : memref<16x128xf32, #tpu.memory_space<vmem>>, vector<16x128xf32>
      %c0_12 = arith.constant 0 : index
      %c0_13 = arith.constant 0 : index
      %13 = vector.load %arg5[%c0_12, %c0_13] : memref<1x128xf32, #tpu.memory_space<vmem>>, vector<1x128xf32>
      %14 = vector.broadcast %13 : vector<1x128xf32> to vector<16x128xf32>
      %15 = arith.addf %12, %14 : vector<16x128xf32>
      %16 = arith.truncf %15 : vector<16x128xf32> to vector<16x128xbf16>
      %c0_14 = arith.constant 0 : index
      %c0_15 = arith.constant 0 : index
      %17 = vector.load %arg6[%c0_14, %c0_15] : memref<16x128xbf16, #tpu.memory_space<vmem>>, vector<16x128xbf16>
      tpu.vector_store %arg6[%c0_14, %c0_15], %16 {strides = array<i32>} : memref<16x128xbf16, #tpu.memory_space<vmem>>, vector<16x128xbf16>,
    } else {
    }
    return
  }
  func.func @transform_0(%arg0: i32, %arg1: i32, %arg2: i32) -> (i32, i32) {
    %c0_i32 = arith.constant 0 : i32
    return %arg0, %arg2 : i32, i32
  }
  func.func @transform_1(%arg0: i32, %arg1: i32, %arg2: i32) -> (i32, i32) {
    %c0_i32 = arith.constant 0 : i32
    return %arg2, %arg1 : i32, i32
  }
  func.func @transform_2(%arg0: i32, %arg1: i32, %arg2: i32) -> (i32, i32) {
    %c0_i32 = arith.constant 0 : i32
    %c0_i32_0 = arith.constant 0 : i32
    return %c0_i32, %arg1 : i32, i32
  }
  func.func @transform_3(%arg0: i32, %arg1: i32, %arg2: i32) -> (i32, i32) {
    %c0_i32 = arith.constant 0 : i32
    return %arg0, %arg1 : i32, i32
  }
}

</mosaic_0001>

<bundles_post_ra>
// kernel: tpu_custom_call.1
= control target key start
LH: loop header
LB: loop body
LE: loop exit
PB: predicated region body
PF: predicated region fallthrough
CT: control target
= control target key end

     0   :  { %8 = vsyncpa [#allocation4], 0  ;;  %s1097_s0 = inlined_call_operand.hbm [shape: bf16[16,128], index: 0, kind: input, shape index: {}]   ;;  %s1098_s1 = inlined_call_operand.hbm [shape: bf16[128,256], index: 1, kind: input, shape index: {}]   ;;  %s1099_s2 = inlined_call_operand.vmem [shape: f32[1,256], index: 2, kind: input, shape index: {}]   ;;  %s1100_s3 = inlined_call_operand.hbm [shape: bf16[16,256], index: 3, kind: output, shape index: {}]  }
   0x1   :  { %9 = vsyncpa [#allocation7], 0 }
   0x2   :  { %11 = vsyncpa [#allocation7 + $0x1], 0 }
   0x3   :  { %12 = vsyncpa [#allocation5], 0 }
   0x4   :  { %14 = vsyncpa [#allocation5 + $0x1], 0  ;;  %s866_s12 = smov 0   ;;  %s868_s13 = smov 0  }
   0x5   :  { %s870_s14 = smov 0   ;;  %s872_s15 = smov 0  }
   0x6   :  { %s874_s16 = smov 0   ;;  %s876_s17 = smov 0  }
   0x7 LB: > { %s536_s18 = sadd.s32 4294967295, %s833_s17   ;;  %s537_s19 = sadd.s32 4294967294, %s833_s17   ;;  %s833_s17 = sphi %s876_s17, %s20_s17   ;;  %s829_s16 = sphi %s874_s16, %s1128_s16   ;;  %s825_s15 = sphi %s872_s15, %s1127_s15   ;;  %s821_s14 = sphi %s870_s14, %s1126_s14   ;;  %s817_s13 = sphi %s868_s13, %s1125_s13   ;;  %s813_s12 = sphi %s866_s12, %s1124_s12  }
   0x8   : > { %p83_p0 = scmp.ne.s32.totalorder %s821_s14, %s817_s13  ;;  %p84_p1 = scmp.eq.s32.totalorder %s833_s17, 0 }
   0x9   : > { %p89_p2 = scmp.ne.s32.totalorder %s817_s13, %s813_s12  ;;  %p903_p3 = scmp.eq.s32.totalorder %s536_s18, 0 }
   0xa   : > { %p907_p4 = por %p84_p1, %p83_p0  ;;  %p141_p5 = scmp.eq.s32.totalorder %s536_s18, 1 }
   0xb   : > { %s1108_s20 = scalar_select %p903_p3, 1, 0 }
   0xc   : > { %p913_p6 = por %p903_p3, %p89_p2  ;;  %p147_p7 = scmp.eq.s32.totalorder %s537_s19, 1 }
   0xd   : > { %p917_p8 = por %p141_p5, %p83_p0  ;;  %p538_p9 = scmp.ge.s32.totalorder %s833_s17, 1 }
   0xe   : > { %s1110_s22 = scalar_select %p913_p6, 1, 0 }
   0xf   : > { %s1111_s23 = scalar_select %p917_p8, 1, 0 }
  0x10   : > { %p922_p10 = por %p147_p7, %p89_p2  ;;  %p154_p11 = scmp.lt.s32.totalorder %s833_s17, 3 }
  0x11   : > { %s835_s26 = smov [#allocation3]   ;;  %p620_p1 = scmp.lt.s32.totalorder %s833_s17, 2 }
  0x12   : > { %s1112_s24 = scalar_select %p922_p10, 1, 0 }
  0x13   : > { %p927_p12 = pnand %p538_p9, %p154_p11  ;;  %s170_s27 = sshll.u32 %s835_s26, 4  ;;  %s931_s27 = int_to_ptr.vmem [resolvable:$true] %s170_s27 }
  0x14   : > { %p945_p2 = pnand %p620_p1, %p907_p4  ;;  %s35_s30 = sadd.s32 1, %s829_s16 }
  0x15   : > { %s1113_s25 = scalar_select %p927_p12, 1, 0 }
  0x16   : > { %p607_p13 = pneg %p927_p12  ;;  %s689_s6 = scalar_lea.hbm %s1097_s0, 128 }
  0x17   : > { %s1115_s29 = scalar_select %p945_p2, 1, 0 }
  0x18   : > { %p939_p5 = pnand %p607_p13, %p903_p3  ;;  %p690_p7 = scmp.ne.s32.totalorder %s1097_s0, %s689_s6 }
  0x19   : > { %p696_p4 = scmp.lt.u32.totalorder %s689_s6, %s1097_s0 }
  0x1a   : > { %p691_p9 = pneg %p939_p5 }
  0x1c   : > { %p692_p11 = pnand %p691_p9, %p690_p7 }
  0x1e   : > { %p693_p13 = pneg %p692_p11 }
  0x20   : > { %p698_p1 = pnand %p696_p4, %p693_p13 }
  0x22   : > { %701 = shalt.err (!%p698_p1)
}
  0x23   : > { %s702_s11 = scalar_lea.vmem %s931_s27, 128  ;;  %p710_p6 = scmp.lt.s32.totalorder %s931_s27, %s931_s27 }
  0x24   : > { %p703_p0 = scmp.ne.s32.totalorder %s931_s27, %s702_s11  ;;  %p711_p3 = scmp.lt.s32.totalorder %s702_s11, %s702_s11 }
  0x26   : > { %p705_p10 = pnand %p703_p0, %p691_p9  ;;  %p712_p12 = por %p711_p3, %p710_p6 }
  0x28   : > { %p706_p8 = pneg %p705_p10 }
  0x2a   : > { %p713_p2 = pnand %p712_p12, %p706_p8 }
  0x2c   : > { %716 = shalt.err (!%p713_p2)
}
  0x2d   : > { %s1107_s18 = smov 64   ;;  %s837_s19 = smov 4  }
  0x2e   : > { %610 = dma.hbm_to_vmem [thread:$0]  (!%p939_p5), %s1097_s0, 128, %s931_s27, [#allocation4], %s1107_s18, %s1107_s18, %s837_s19  }
  0x2f   : > { %p37_p3 = scmp.ge.s32.totalorder %s35_s30, 2  ;;  %s76_s4 = sadd.s32 1, %s821_s14 }
  0x30   : > { %s184_s5 = sand.u32 1, %s821_s14   ;;  %s542_s8 = sshll.u32 %s829_s16, 6 }
  0x31   : > { %s1130_s30 = smov (%p37_p3, %s35_s30), 0  ;;  %s541_s6 = sshll.u32 %s184_s5, 6 }
  0x32   : > { %s72_s7 = ssub.s32 %s829_s16, %s1130_s30  ;;  %s984_s10 = scalar_lea.hbm %s1098_s1, %s542_s8 }
  0x33   : > { %p74_p6 = scmp.eq.s32.totalorder %s72_s7, 0  ;;  %s188_s27 = scalar_lea.vmem [#allocation6], %s541_s6 }
  0x34   : > { %s197_s11 = sshll.u32 %s188_s27, 4  ;;  %s991_s26 = scalar_lea.sflag [#allocation7], %s184_s5  ;;  %s989_s11 = int_to_ptr.vmem [resolvable:$true] %s197_s11 }
  0x35   : > { %s987_s21 = scalar_select %p74_p6, %s821_s14, %s76_s4  }
  0x36   : > { %s717_s18 = scalar_lea.hbm %s984_s10, 1024  ;;  %p1116_p10 = scmp.ne.s32.totalorder %s1115_s29, 0 }
  0x37   : > { %p718_p8 = scmp.ne.s32.totalorder %s984_s10, %s717_s18  ;;  %s722_s28 = scalar_lea.hbm %s1098_s1, 2048 }
  0x38   : > { %p719_p12 = pneg %p1116_p10  ;;  %p723_p2 = scmp.lt.u32.totalorder %s984_s10, %s1098_s1 }
  0x39   : > { %p724_p7 = scmp.lt.u32.totalorder %s722_s28, %s717_s18  ;;  %p726_p11 = scmp.lt.u32.totalorder %s717_s18, %s984_s10 }
  0x3a   : > { %p720_p0 = pnand %p719_p12, %p718_p8 }
  0x3b   : > { %p725_p9 = por %p724_p7, %p723_p2 }
  0x3c   : > { %p721_p5 = pneg %p720_p0 }
  0x3d   : > { %p727_p13 = por %p726_p11, %p725_p9 }
  0x3f   : > { %p728_p4 = pnand %p727_p13, %p721_p5 }
  0x41   : > { %731 = shalt.err (!%p728_p4)
}
  0x42   : > { %s732_s4 = scalar_lea.vmem %s989_s11, 1024  ;;  %s838_s5 = smov [#allocation6]  }
  0x43   : > { %p733_p1 = scmp.ne.s32.totalorder %s989_s11, %s732_s4  ;;  %s737_s27 = sshll.u32 %s838_s5, 4  ;;  %s738_s27 = int_to_ptr.vmem [resolvable:$false] %s737_s27 }
  0x44   : > { %s739_s7 = scalar_lea.vmem %s738_s27, 2048  ;;  %p740_p8 = scmp.lt.s32.totalorder %s989_s11, %s738_s27 }
  0x45   : > { %p735_p3 = pnand %p733_p1, %p719_p12  ;;  %p741_p0 = scmp.lt.s32.totalorder %s739_s7, %s732_s4 }
  0x47   : > { %p736_p6 = pneg %p735_p3  ;;  %p742_p2 = por %p741_p0, %p740_p8 }
  0x49   : > { %p743_p7 = pnand %p742_p2, %p736_p6 }
  0x4b   : > { %746 = shalt.err (!%p743_p7)
}
  0x4c   : > { %s839_s18 = smov 128   ;;  %s1117_s8 = smov 64  }
  0x4d   : > { %614 = dma.hbm_to_vmem [thread:$0]  (!%p1116_p10), %s984_s10, 1024, %s989_s11, %s991_s26, %s839_s18, %s1117_s8, %s837_s19  }
  0x4e   : > { %p1118_p12 = scmp.ne.s32.totalorder %s1113_s25, 0 }
  0x4f   : > { %p1119_p5 = scmp.ne.s32.totalorder (!%p1118_p12), %s1108_s20, 0 }
  0x50   : > { %215 = sbr.rel (%p1118_p12) target bundleno = 359 (0x167), region = 32 }
  0x57   : > { %800 = dma.done.wait (%p1119_p5), [#allocation4], 128  }
  0x58   : > { %802 = vsyncadd (%p1119_p5), [#allocation4], 4294967168  ;;  %s1028_s28 = sand.u32 1, %s817_s13   ;;  %p1120_p9 = scmp.ne.s32.totalorder %s1110_s22, 0 }
  0x59   : > { %s545_s29 = sshll.u32 %s1028_s28, 6  ;;  %s222_s6 = scalar_lea.sflag [#allocation7], %s1028_s28 }
  0x5a   : > { %s225_s9 = scalar_lea.vmem [#allocation6], %s545_s29 }
  0x5b   : > { %804 = dma.done.wait (%p1120_p9), %s222_s6, 1024  }
  0x5c   : > { %806 = vsyncadd (%p1120_p9), %s222_s6, 4294966272  ;;  %v840_v0 = vmov 0.0   ;;  %vm841_vm0 = vmmov 0   ;;  %v680_v1 = vld [vmem:[%s225_s9] sm:$0xff]   ;;  %v681_v2 = vld [vmem:[%s225_s9 + $0x8] sm:$0xff]   ;;  %p253_p10 = scmp.lt.s32.totalorder %s825_s15, 1 }
  0x5d   : > { %579 = vmatprep.subr.bf16.mxu0 %v840_v0  ;;  %595 = vmatprep.mubr.msk.bf16.mxu0 %vm841_vm0, %v840_v0  ;;  %v682_v3 = vld [vmem:[%s225_s9 + $0x10] sm:$0xff]   ;;  %v683_v4 = vld [vmem:[%s225_s9 + $0x18] sm:$0xff]   ;;  %v684_v5 = vld [vmem:[%s225_s9 + $0x20] sm:$0xff]   ;;  %s546_s22 = sshll.u32 %s1028_s28, 3  ;;  %s560_s4 = sshll.u32 %s825_s15, 6 }
  0x5e   : > { %580 = vmatpush3.bf16.msra.mxu0 %v680_v1  ;;  %v685_v6 = vld [vmem:[%s225_s9 + $0x28] sm:$0xff]   ;;  %v686_v7 = vld [vmem:[%s225_s9 + $0x30] sm:$0xff]   ;;  %v687_v8 = vld [vmem:[%s225_s9 + $0x38] sm:$0xff]   ;;  %s254_s20 = scalar_select %p253_p10, %s825_s15, 1 }
  0x5f   : > { %581 = vmatprep.subr.bf16.mxu0 %v840_v0  ;;  %v688_v9 = vld [vmem:[#allocation3] sm:$0xff]   ;;  %s250_s11 = scalar_lea.vmem [#allocation8], %s546_s22  ;;  %s1048_s7 = scalar_lea.hbm %s1100_s3, %s560_s4 }
  0x60   : > { %s255_s10 = scalar_lea.vmem %s1099_s2, %s254_s20  ;;  %s423_s26 = sshll.u32 %s250_s11, 4  ;;  %s1043_s26 = int_to_ptr.vmem [resolvable:$true] %s423_s26 }
  0x61   : > { %v556_v11 = vld [vmem:[%s255_s10] ss:$0 sm:$0xff]  ;;  %s408_s18 = scalar_lea.sflag [#allocation5], %s1028_s28  ;;  %s747_s8 = scalar_lea.vmem %s1043_s26, 128 }
  0x62   : > { %582 = vmatpush3.bf16.msra.mxu0 %v681_v2  ;;  %p748_p11 = scmp.ne.s32.totalorder %s1043_s26, %s747_s8  ;;  %p1121_p13 = scmp.ne.s32.totalorder %s1111_s23, 0 }
  0x63   : > { %583 = vmatprep.subr.bf16.mxu0 %v840_v0  ;;  %s842_s15 = smov [#allocation8]  }
  0x64   : > { %p749_p4 = pnand %p748_p11, %p1121_p13  ;;  %s751_s29 = sshll.u32 %s842_s15, 4  ;;  %s752_s29 = int_to_ptr.vmem [resolvable:$false] %s751_s29 }
  0x65   : > { %s753_s6 = scalar_lea.vmem %s752_s29, 256  ;;  %p754_p3 = scmp.lt.s32.totalorder %s1043_s26, %s752_s29 }
  0x66   : > { %584 = vmatpush3.bf16.msra.mxu0 %v682_v3  ;;  %p750_p1 = pneg %p749_p4  ;;  %p755_p6 = scmp.lt.s32.totalorder %s753_s6, %s747_s8 }
  0x67   : > { %585 = vmatprep.subr.bf16.mxu0 %v840_v0 }
  0x68   : > { %p756_p8 = por %p755_p6, %p754_p3 }
  0x6a   : > { %586 = vmatpush3.bf16.msra.mxu0 %v683_v4  ;;  %p757_p0 = pnand %p756_p8, %p750_p1 }
  0x6b   : > { %587 = vmatprep.subr.bf16.mxu0 %v840_v0 }
  0x6e   : > { %588 = vmatpush3.bf16.msra.mxu0 %v684_v5 }
  0x6f   : > { %589 = vmatprep.subr.bf16.mxu0 %v840_v0 }
  0x72   : > { %590 = vmatpush3.bf16.msra.mxu0 %v685_v6 }
  0x73   : > { %591 = vmatprep.subr.bf16.mxu0 %v840_v0 }
  0x76   : > { %592 = vmatpush3.bf16.msra.mxu0 %v686_v7 }
  0x77   : > { %593 = vmatprep.subr.bf16.mxu0 %v840_v0 }
  0x7a   : > { %594 = vmatpush3.bf16.msra.mxu0 %v687_v8 }
  0x7d   : > { %596 = vmatmul.mubr.bf16.vlgmr.msra.gmra.mrb[0].mxu0 %v688_v9 }
 0x150   : > { %v372_v10 = vpop.f32.mrb[0].mxu0 }
 0x151   : > { %v597_v12 = vpop.f32.mrb[1].mxu0  ;;  %v395_v14 = vadd.f32 %v556_v11, %v372_v10 }
 0x152   : > { %v375_v13 = vpop.f32.mrb[2].mxu0 }
 0x153   : > { %v396_v15 = vadd.f32 %v556_v11, %v375_v13  ;;  %v598_v16 = vpop.f32.mrb[3].mxu0 }
 0x155   : > { %v568_v17 = vpack.c.bf16 %v396_v15, %v395_v14 }
 0x157   : > { %569 = vst [vmem:[%s250_s11] sm:$0xff] %v568_v17  }
 0x158   : > { %760 = shalt.err (!%p757_p0)
}
 0x159   : > { %s761_s9 = scalar_lea.hbm %s1048_s7, 128  ;;  %s765_s25 = scalar_lea.hbm %s1100_s3, 256 }
 0x15a   : > { %p762_p2 = scmp.ne.s32.totalorder %s1048_s7, %s761_s9  ;;  %p766_p5 = scmp.lt.u32.totalorder %s1048_s7, %s1100_s3 }
 0x15b   : > { %p767_p9 = scmp.lt.u32.totalorder %s765_s25, %s761_s9  ;;  %p769_p11 = scmp.lt.u32.totalorder %s761_s9, %s1048_s7 }
 0x15c   : > { %p763_p7 = pnand %p762_p2, %p1121_p13 }
 0x15d   : > { %p768_p10 = por %p767_p9, %p766_p5 }
 0x15e   : > { %p764_p12 = pneg %p763_p7 }
 0x15f   : > { %p770_p4 = por %p769_p11, %p768_p10 }
 0x161   : > { %p771_p1 = pnand %p770_p4, %p764_p12 }
 0x163   : > { %774 = shalt.err (!%p771_p1)
}
 0x164   : > { %s843_s11 = smov 64   ;;  %s844_s4 = smov 128  }
 0x165   : > { %s845_s5 = smov 4  }
 0x166   : > { %605 = dma.vmem_to_hbm [thread:$0]  (%p1121_p13), %s1043_s26, 128, %s1048_s7, %s408_s18, %s843_s11, %s844_s4, %s845_s5  }
 0x167 PF: > { %s438_s27 = sand.u32 1, %s813_s12   ;;  %p1122_p3 = scmp.ne.s32.totalorder %s1112_s24, 0 }
 0x168   : > { %p1123_p6 = scmp.ge.s32.totalorder %s833_s17, 2  ;;  %s439_s8 = scalar_lea.sflag [#allocation5], %s438_s27 }
 0x16a   : > { %p616_p8 = pnand %p1123_p6, %p1122_p3 }
 0x16c   : > { %808 = dma.done.wait (!%p616_p8), %s439_s8, 128  }
 0x16d   : > { %810 = vsyncadd (!%p616_p8), %s439_s8, 4294967168  ;;  %s20_s17 = sadd.s32 1, %s833_s17   ;;  %s1124_s12 = smov %s817_s13 }
 0x16e   : > { %p17_p0 = scmp.ge.s32.totalorder %s20_s17, 4   ;;  %s1125_s13 = smov %s821_s14 }
 0x16f   : > { %s1126_s14 = smov %s987_s21  ;;  %s1127_s15 = smov %s829_s16 }
 0x170   : > { %s1128_s16 = smov %s1130_s30  ;;  %19 = sbr.rel (!%p17_p0) target bundleno = 7 (0x7), region = 94 }
 0x177   :  { %444 = vsyncpa [#allocation4], 1 }
 0x178   :  { %446 = vsyncpa [#allocation4 + $0x1], 1 }
 0x179   :  { %447 = vsyncpa [#allocation7], 1 }
 0x17a   :  { %449 = vsyncpa [#allocation7 + $0x1], 1 }
 0x17b   :  { %450 = vsyncpa [#allocation5], 1 }
 0x17c   :  { %452 = vsyncpa [#allocation5 + $0x1], 1 }

</bundles_post_ra>
